<compile_context>
chip_gen: v7x
topology: tpu7x:2x2x1
jax: 0.10.0
libtpu: 0.0.40
codegen_flags: <defaults>
</compile_context>

<pallas_src>
import jax
import jax.numpy as jnp
from jax.experimental import pallas as pl
from jax.experimental.pallas import tpu as pltpu


def _linear_kernel(x_ref, w_ref, b_ref, o_ref):
    # x_ref: (tb, in_f) batch tile, straight from HBM (no host transpose).
    # w_ref: (out_f, in_f) VMEM-resident weights; b_ref: (out_f, 1) bias.
    # Contract the shared in_f axis on the MXU: (out,in) x (tb,in) -> (out,tb).
    y = jax.lax.dot_general(
        w_ref[...], x_ref[...],
        dimension_numbers=(((1,), (1,)), ((), ())),
        preferred_element_type=jnp.float32,
    )
    o_ref[...] = (y + b_ref[...]).astype(o_ref.dtype)  # (out,tb) + (out,1) bcast


def _rup(x, m):
    return -(-x // m) * m


def _round_tb(tb, batch):
    """Clamp/round a requested batch tile to a legal lane tile."""
    if tb >= batch:
        return batch                       # full extent is always legal
    tb = (tb // 128) * 128                 # lane-axis granule
    return batch if tb == 0 else tb


def _auto_tb(batch, in_f, target_bytes=8 << 20):
    """Budget-sized batch tile: MB-scale per-step DMAs, >=2 grid steps."""
    in_f_vmem = _rup(in_f, 128)            # x tile is lane-padded in VMEM
    tb = max(128, (target_bytes // (in_f_vmem * 4)) // 128 * 128)
    if batch >= 2 * 128:                   # keep >=2 tiles so v7x's 2 TCs get work
        tb = min(tb, max(128, (batch // 2) // 128 * 128))
    return _round_tb(tb, batch)


def linear_model_forward(x, w, b, *, block_b=None):
    """Forward pass of LinearModel.

    x: (B, in_f) float32
    w: (out_f, in_f) float32   (torch nn.Linear.weight layout)
    b: (out_f,)   float32
    returns: squeeze(x @ w.T + b)  — matches torch.squeeze semantics.
    """
    batch, in_f = x.shape
    out_f = w.shape[0]

    tb = _auto_tb(batch, in_f) if block_b is None else _round_tb(min(block_b, batch), batch)
    grid_b = pl.cdiv(batch, tb)            # ragged tail handled by partial blocks
    b2d = b.reshape(out_f, 1)

    # VMEM footprint (with (8,128) tile padding): double-buffered x and y
    # tiles plus resident W / bias.  Set the scoped limit with headroom so
    # v5e's 16 MiB default doesn't shrink the pipeline.
    x_buf = tb * _rup(in_f, 128) * 4
    y_buf = _rup(out_f, 8) * _rup(tb, 128) * 4
    w_buf = _rup(out_f, 8) * _rup(in_f, 128) * 4
    need = 2 * x_buf + 2 * y_buf + w_buf + 8 * 128 * 4
    vmem_limit = int(min(max(need + (4 << 20), 32 << 20), 100 << 20))

    yT = pl.pallas_call(
        _linear_kernel,
        out_shape=jax.ShapeDtypeStruct((out_f, batch), jnp.float32),
        grid=(grid_b,),
        in_specs=[
            pl.BlockSpec((tb, in_f), lambda i: (i, 0)),      # x: streamed over batch
            pl.BlockSpec((out_f, in_f), lambda i: (0, 0)),   # W: VMEM-resident
            pl.BlockSpec((out_f, 1), lambda i: (0, 0)),      # b: VMEM-resident
        ],
        out_specs=pl.BlockSpec((out_f, tb), lambda i: (0, i)),  # lane-dense output
        compiler_params=pltpu.CompilerParams(
            dimension_semantics=("parallel",),   # shard batch tiles across TCs (v7x)
            vmem_limit_bytes=vmem_limit,
        ),
    )(x, w, b2d)

    y = yT.T                               # (B, out_f); tiny vs. the x stream
    # torch.squeeze removes ALL size-1 dims (batch=1 and/or out=1 collapse).
    return jnp.squeeze(y)


def init_params(key, in_shape, out_shape):
    """nn.Linear default init: uniform(-1/sqrt(fan_in), +1/sqrt(fan_in))."""
    k1, k2 = jax.random.split(key)
    lim = 1.0 / jnp.sqrt(jnp.float32(in_shape))
    w = jax.random.uniform(k1, (out_shape, in_shape), jnp.float32, -lim, lim)
    b = jax.random.uniform(k2, (out_shape,), jnp.float32, -lim, lim)
    return w, b


if __name__ == "__main__":
    key = jax.random.PRNGKey(0)
    k_x, k_p = jax.random.split(key)

    batch, in_shape, out_shape = 256, 16, 2
    x = jax.random.normal(k_x, (batch, in_shape), jnp.float32)
    w, b = init_params(k_p, in_shape, out_shape)

    # block_b=128 so the demo exercises a 2-step pipelined batch grid.
    y = linear_model_forward(x, w, b, block_b=128)
    jax.block_until_ready(y)

    # Plain-JAX reference (x @ W.T + b, then squeeze) — same math as torch.
    ref = jnp.squeeze(x @ w.T + b)
    assert y.shape == ref.shape, (y.shape, ref.shape)
    assert jnp.allclose(y, ref, atol=1e-5, rtol=1e-5)

    # Also exercise the auto tile-size path once.
    y2 = linear_model_forward(x, w, b)
    jax.block_until_ready(y2)
    assert jnp.allclose(y2, ref, atol=1e-5, rtol=1e-5)

    print("KERNEL_OK")
</pallas_src>

<mosaic_0001>
module attributes {stable_mosaic.version = 11 : i64} {
  func.func @_linear_kernel(%arg0: i32, %arg1: memref<128x16xf32, #tpu.memory_space<vmem>>, %arg2: memref<2x16xf32, #tpu.memory_space<vmem>>, %arg3: memref<2x1xf32, #tpu.memory_space<vmem>>, %arg4: memref<2x128xf32, #tpu.memory_space<vmem>>) attributes {dimension_semantics = [#tpu.dimension_semantics<parallel>], iteration_bounds = array<i64: 2>, scalar_prefetch = 0 : i64, scratch_operands = 0 : i64, tpu.core_type = #tpu.core_type<tc>, window_params = [{transform_indices = @transform_0, window_bounds = array<i64: 128, 16>}, {pipeline_mode = #tpu.pipeline_mode<synchronous>, transform_indices = @transform_1, window_bounds = array<i64: 2, 16>}, {pipeline_mode = #tpu.pipeline_mode<synchronous>, transform_indices = @transform_2, window_bounds = array<i64: 2, 1>}, {transform_indices = @transform_3, window_bounds = array<i64: 2, 128>}]} {
    %c0 = arith.constant 0 : index
    %c0_0 = arith.constant 0 : index
    %0 = vector.load %arg2[%c0, %c0_0] : memref<2x16xf32, #tpu.memory_space<vmem>>, vector<2x16xf32>
    %c0_1 = arith.constant 0 : index
    %c0_2 = arith.constant 0 : index
    %1 = vector.load %arg1[%c0_1, %c0_2] : memref<128x16xf32, #tpu.memory_space<vmem>>, vector<128x16xf32>
    %cst = arith.constant dense<0.000000e+00> : vector<2x128xf32>
    %2 = tpu.matmul %0, %1, %cst {dimension_numbers = #tpu.dot_dimension_numbers<[1], [1], [0], [0], [0, 0, 1, 0], [], []>} : vector<2x16xf32>, vector<128x16xf32>, vector<2x128xf32> -> vector<2x128xf32>
    %c0_3 = arith.constant 0 : index
    %c0_4 = arith.constant 0 : index
    %3 = vector.load %arg3[%c0_3, %c0_4] : memref<2x1xf32, #tpu.memory_space<vmem>>, vector<2x1xf32>
    %4 = vector.broadcast %3 : vector<2x1xf32> to vector<2x128xf32>
    %5 = arith.addf %2, %4 : vector<2x128xf32>
    %c0_5 = arith.constant 0 : index
    %c0_6 = arith.constant 0 : index
    %6 = vector.load %arg4[%c0_5, %c0_6] : memref<2x128xf32, #tpu.memory_space<vmem>>, vector<2x128xf32>
    tpu.vector_store %arg4[%c0_5, %c0_6], %5 {strides = array<i32>} : memref<2x128xf32, #tpu.memory_space<vmem>>, vector<2x128xf32>,
    return
  }
  func.func @transform_0(%arg0: i32) -> (i32, i32) {
    %c0_i32 = arith.constant 0 : i32
    %c0_i32_0 = arith.constant 0 : i32
    return %arg0, %c0_i32 : i32, i32
  }
  func.func @transform_1(%arg0: i32) -> (i32, i32) {
    %c0_i32 = arith.constant 0 : i32
    %c0_i32_0 = arith.constant 0 : i32
    %c0_i32_1 = arith.constant 0 : i32
    return %c0_i32, %c0_i32_0 : i32, i32
  }
  func.func @transform_2(%arg0: i32) -> (i32, i32) {
    %c0_i32 = arith.constant 0 : i32
    %c0_i32_0 = arith.constant 0 : i32
    %c0_i32_1 = arith.constant 0 : i32
    return %c0_i32, %c0_i32_0 : i32, i32
  }
  func.func @transform_3(%arg0: i32) -> (i32, i32) {
    %c0_i32 = arith.constant 0 : i32
    %c0_i32_0 = arith.constant 0 : i32
    return %c0_i32, %arg0 : i32, i32
  }
}

</mosaic_0001>

<bundles_post_ra>
// kernel: tpu_custom_call.1
= control target key start
LH: loop header
LB: loop body
LE: loop exit
PB: predicated region body
PF: predicated region fallthrough
CT: control target
= control target key end

     0   :  { %8 = vsyncpa [#allocation3], 0  ;;  %s781_s0 = inlined_call_operand.vmem [shape: f32[256,16], index: 0, kind: input, shape index: {}]   ;;  %s782_s1 = inlined_call_operand.vmem [shape: f32[2,16], index: 1, kind: input, shape index: {}]   ;;  %s783_s2 = inlined_call_operand.vmem [shape: f32[2,1], index: 2, kind: input, shape index: {}]   ;;  %s784_s3 = inlined_call_operand.hbm [shape: f32[2,256], index: 3, kind: output, shape index: {}]  }
   0x1   :  { %10 = vsyncpa [#allocation3 + $0x1], 0  ;;  %s635_s12 = smov 0   ;;  %s637_s13 = smov 0  }
   0x2   :  { %s639_s14 = smov 0   ;;  %s641_s15 = smov 0  }
   0x3 LB: > { %s656_s16 = sadd.s32 4294967295, %s608_s15   ;;  %s390_s17 = sadd.s32 4294967294, %s608_s15   ;;  %s608_s15 = sphi %s641_s15, %s792_s15   ;;  %s604_s14 = sphi %s639_s14, %s791_s14   ;;  %s600_s13 = sphi %s637_s13, %s790_s13   ;;  %s596_s12 = sphi %s635_s12, %s789_s12  }
   0x4   : > { %s660_s18 = sadd.s32 1, %s608_s15   ;;  %s91_s19 = sadd.s32 1, %s604_s14 }
   0x5   : > { %s88_s20 = ssub.s32 %s608_s15, %s660_s18  ;;  %p101_p0 = scmp.ne.s32.totalorder %s604_s14, %s600_s13 }
   0x6   : > { %p89_p1 = scmp.eq.s32.totalorder %s88_s20, 0  ;;  %p102_p2 = scmp.eq.s32.totalorder %s656_s16, 1 }
   0x7   : > { %p107_p3 = scmp.ne.s32.totalorder %s600_s13, %s596_s12  ;;  %p108_p4 = scmp.eq.s32.totalorder %s390_s17, 1 }
   0x8   : > { %s671_s21 = scalar_select %p89_p1, %s604_s14, %s91_s19  }
   0x9   : > { %p673_p5 = por %p102_p2, %p101_p0  ;;  %p677_p6 = por %p108_p4, %p107_p3 }
   0xa   : > { %p393_p7 = scmp.ge.s32.totalorder %s608_s15, 1  ;;  %p141_p8 = scmp.lt.s32.totalorder %s608_s15, 3 }
   0xc   : > { %p142_p9 = pnand %p393_p7, %p141_p8 }
   0xd   : > { %s395_s24 = sshll.u32 (!%p142_p9), %s656_s16, 4  ;;  %v610_v0 = vmov (!%p142_p9), 0.0|0.0   ;;  %vm611_vm0 = vmmov (!%p142_p9), 0   ;;  %v612_v1 = vmov (!%p142_p9), 0.0   ;;  %v188_v2 = vld [vmem:[%s783_s2] sm:$0x3] (!%p142_p9) }
   0xe   : > { %145 = sbr.rel (%p142_p9) target bundleno = 318 (0x13e), region = 32  ;;  %470 = vmatprep.subr.bf16.mxu0 (!%p142_p9), %v610_v0  ;;  %p166_p10 = scmp.lt.s32.totalorder (!%p142_p9), %s395_s24, 31  ;;  %467 = vmatprep.mubr.msk.f32.mxu0 (!%p142_p9), %vm611_vm0, %v612_v1  ;;  %v613_v3 = vmov (!%p142_p9), 0   ;;  %vm194_vm1 = vcmask (!%p142_p9), 130048   ;;  %v171_v29 = vld [vmem:[%s782_s1] sm:$0x3] (!%p142_p9) }
   0xf   : > { %545 = vset.pattern.permute.xlu0 (!%p142_p9), %v613_v3  ;;  %vm696_vm2 = vmpackc.low (!%p142_p9), %vm194_vm1, %vm194_vm1  ;;  %s162_s6 = sand.u32 (!%p142_p9), 1, %s600_s13   ;;  %s415_s8 = sshll.u32 (!%p142_p9), %s656_s16, 5 }
  0x10   : > { %191 = vperm.xlu0 (!%p142_p9), %545, %v188_v2   ;;  %s394_s7 = sshll.u32 (!%p142_p9), %s162_s6, 1  ;;  %s739_s19 = scalar_lea.hbm (!%p142_p9), %s784_s3, %s415_s8 }
  0x11   : > { %s164_s9 = scalar_lea.vmem (!%p142_p9), [#allocation2], %s394_s7  ;;  %s318_s20 = scalar_lea.sflag (!%p142_p9), [#allocation3], %s162_s6 }
  0x12   : > { %s331_s10 = sshll.u32 (!%p142_p9), %s164_s9, 4  ;;  %s614_s16 = smov (!%p142_p9), [#allocation2]   ;;  %s741_s10 = int_to_ptr.vmem [resolvable:$true] %s331_s10 }
  0x13   : > { %s550_s25 = sshll.u32 (!%p142_p9), %s614_s16, 4  ;;  %s551_s25 = int_to_ptr.vmem [resolvable:$false] %s550_s25 }
  0x14   : > { %s552_s26 = scalar_lea.vmem (!%p142_p9), %s551_s25, 64  ;;  %p553_p0 = scmp.lt.s32.totalorder (!%p142_p9), %s741_s10, %s551_s25 }
  0x15   : > { %s794_s24 = smov (!%p166_p10, %s395_s24), 31 }
  0x16   : > { %s396_s27 = sshll.u32 %s794_s24, 3  ;;  %s546_s24 = scalar_lea.vmem %s741_s10, 32 }
  0x17   : > { %s690_s30 = scalar_lea.vmem %s781_s0, %s396_s27  ;;  %p547_p11 = scmp.ne.s32.totalorder %s741_s10, %s546_s24 }
  0x18   : > { %v172_v4 = vld [vmem:[%s690_s30] sm:$0xff]  ;;  %v173_v5 = vld [vmem:[%s690_s30 + $0x8] sm:$0xff]  ;;  %v174_v8 = vld [vmem:[%s690_s30 + $0x10] sm:$0xff]  ;;  %p554_p1 = scmp.lt.s32.totalorder %s552_s26, %s546_s24 }
  0x19   : > { %v471_v7 = vpack.c.bf16 %v173_v5, %v172_v4  ;;  %v175_v9 = vld [vmem:[%s690_s30 + $0x18] sm:$0xff]  ;;  %v176_v11 = vld [vmem:[%s690_s30 + $0x20] sm:$0xff]  ;;  %v177_v12 = vld [vmem:[%s690_s30 + $0x28] sm:$0xff]  ;;  %p548_p12 = pnand %p547_p11, %p673_p5 }
  0x1a   : > { %v475_v10 = vpack.c.bf16 %v175_v9, %v174_v8  ;;  %v479_v13 = vpack.c.bf16 %v177_v12, %v176_v11  ;;  %v178_v14 = vld [vmem:[%s690_s30 + $0x30] sm:$0xff]  ;;  %v179_v15 = vld [vmem:[%s690_s30 + $0x38] sm:$0xff]  ;;  %v180_v17 = vld [vmem:[%s690_s30 + $0x40] sm:$0xff]  ;;  %p555_p2 = por %p554_p1, %p553_p0 }
  0x1b   : > { %473 = vmatpush3.bf16.xpose.msk.msra.mxu0 %vm696_vm2, %v471_v7  ;;  %v483_v16 = vpack.c.bf16 %v179_v15, %v178_v14  ;;  %v181_v18 = vld [vmem:[%s690_s30 + $0x48] sm:$0xff]  ;;  %v182_v20 = vld [vmem:[%s690_s30 + $0x50] sm:$0xff]  ;;  %v183_v21 = vld [vmem:[%s690_s30 + $0x58] sm:$0xff]  ;;  %p549_p13 = pneg %p548_p12 }
  0x1c   : > { %474 = vmatprep.subr.bf16.mxu0 %v610_v0  ;;  %v487_v19 = vpack.c.bf16 %v181_v18, %v180_v17  ;;  %v491_v22 = vpack.c.bf16 %v183_v21, %v182_v20  ;;  %v184_v23 = vld [vmem:[%s690_s30 + $0x60] sm:$0xff]  ;;  %v185_v24 = vld [vmem:[%s690_s30 + $0x68] sm:$0xff]  ;;  %v186_v26 = vld [vmem:[%s690_s30 + $0x70] sm:$0xff] }
  0x1d   : > { %v495_v25 = vpack.c.bf16 %v185_v24, %v184_v23  ;;  %v187_v27 = vld [vmem:[%s690_s30 + $0x78] sm:$0xff]  ;;  %p556_p3 = pnand %p555_p2, %p549_p13 }
  0x1e   : > { %v499_v28 = vpack.c.bf16 %v187_v27, %v186_v26 }
  0x23   : > { %477 = vmatpush3.bf16.xpose.msk.msra.mxu0 %vm696_vm2, %v475_v10 }
  0x24   : > { %478 = vmatprep.subr.bf16.mxu0 %v610_v0 }
  0x2b   : > { %481 = vmatpush3.bf16.xpose.msk.msra.mxu0 %vm696_vm2, %v479_v13 }
  0x2c   : > { %482 = vmatprep.subr.bf16.mxu0 %v610_v0 }
  0x33   : > { %485 = vmatpush3.bf16.xpose.msk.msra.mxu0 %vm696_vm2, %v483_v16 }
  0x34   : > { %486 = vmatprep.subr.bf16.mxu0 %v610_v0 }
  0x3b   : > { %489 = vmatpush3.bf16.xpose.msk.msra.mxu0 %vm696_vm2, %v487_v19 }
  0x3c   : > { %490 = vmatprep.subr.bf16.mxu0 %v610_v0 }
  0x43   : > { %493 = vmatpush3.bf16.xpose.msk.msra.mxu0 %vm696_vm2, %v491_v22 }
  0x44   : > { %494 = vmatprep.subr.bf16.mxu0 %v610_v0 }
  0x4b   : > { %497 = vmatpush3.bf16.xpose.msk.msra.mxu0 %vm696_vm2, %v495_v25 }
  0x4c   : > { %498 = vmatprep.subr.bf16.mxu0 %v610_v0 }
  0x53   : > { %501 = vmatpush3.bf16.xpose.msk.msra.mxu0 %vm696_vm2, %v499_v28 }
  0x5a   : > { %468 = vmatmul.mubr.msk.f32.vlgmr.msra.gmra.mrb[0].mxu0 %vm194_vm1, %v171_v29 }
  0x8f   : > { %v192_v30 = vpop.permute.xlu0 %191 }
 0x12d   : > { %v312_v31 = vpop.f32.mrb[0].mxu0 }
 0x12e   : > { %v313_v32 = vadd.f32 %v312_v31, %v192_v30  ;;  %v469_v33 = vpop.f32.mrb[1].mxu0 }
 0x130   : > { %316 = vst [vmem:[%s164_s9] sm:$0x3] %v313_v32 }
 0x131   : > { %559 = shalt.err (!%p556_p3)
}
 0x132   : > { %s560_s27 = scalar_lea.hbm %s739_s19, 32  ;;  %s564_s30 = scalar_lea.hbm %s784_s3, 64 }
 0x133   : > { %p561_p4 = scmp.ne.s32.totalorder %s739_s19, %s560_s27  ;;  %p565_p9 = scmp.lt.u32.totalorder %s739_s19, %s784_s3 }
 0x134   : > { %p566_p10 = scmp.lt.u32.totalorder %s564_s30, %s560_s27  ;;  %p568_p12 = scmp.lt.u32.totalorder %s560_s27, %s739_s19 }
 0x135   : > { %p562_p7 = pnand %p561_p4, %p673_p5 }
 0x136   : > { %p567_p11 = por %p566_p10, %p565_p9 }
 0x137   : > { %p563_p8 = pneg %p562_p7 }
 0x138   : > { %p569_p13 = por %p568_p12, %p567_p11 }
 0x13a   : > { %p570_p0 = pnand %p569_p13, %p563_p8 }
 0x13c   : > { %573 = shalt.err (!%p570_p0)
}
 0x13d   : > { %502 = dma.vmem_to_hbm [thread:$0]  (%p673_p5), %s741_s10, 32, %s739_s19, %s318_s20  }
 0x13e PF: > { %p508_p1 = scmp.ge.s32.totalorder %s608_s15, 2  ;;  %s343_s6 = sand.u32 1, %s596_s12  }
 0x13f   : > { %s344_s7 = scalar_lea.sflag [#allocation3], %s343_s6 }
 0x140   : > { %p505_p2 = pnand %p508_p1, %p677_p6 }
 0x142   : > { %591 = dma.done.wait (!%p505_p2), %s344_s7, 32  }
 0x143   : > { %593 = vsyncadd (!%p505_p2), %s344_s7, 4294967264  ;;  %p13_p3 = scmp.ge.s32.totalorder %s660_s18, 4   ;;  %s789_s12 = smov %s600_s13 }
 0x144   : > { %s790_s13 = smov %s604_s14  ;;  %s791_s14 = smov %s671_s21 }
 0x145   : > { %s792_s15 = smov %s660_s18  ;;  %15 = sbr.rel (!%p13_p3) target bundleno = 3 (0x3), region = 67 }
 0x14c   :  { %349 = vsyncpa [#allocation3], 1 }
 0x14d   :  { %351 = vsyncpa [#allocation3 + $0x1], 1 }

</bundles_post_ra>
